<compile_context>
chip_gen: v7x
topology: tpu7x:2x2x1
jax: 0.10.0
libtpu: 0.0.40
codegen_flags: <defaults>
</compile_context>

<pallas_src>
import functools

import jax
import jax.numpy as jnp
from jax import lax
from jax.experimental import pallas as pl
from jax.experimental.pallas import tpu as pltpu

_TINY = 1e-37  # underflow guard for log(s); never active in normal regimes.


def _clip_loss_kernel(scale_ref, img_ref, txt_ref,
                      lse_col_ref, row_ref,
                      m_row, s_row, d_row, m_col, s_col,
                      *, rows_per_split, n_col_tiles):
    c = pl.program_id(0)                    # split (row band group), parallel
    i = pl.program_id(1)                    # row tile within the split
    j = pl.program_id(2)                    # column tile
    gi = c * rows_per_split + i             # global row-tile index
    block = img_ref.shape[0]

    # ---- per-split init of the column-direction accumulators ---------------
    @pl.when(jnp.logical_and(i == 0, j == 0))
    def _():
        m_col[...] = jnp.full_like(m_col, -jnp.inf)
        s_col[...] = jnp.zeros_like(s_col)

    # ---- per-row-tile init --------------------------------------------------
    @pl.when(j == 0)
    def _():
        m_row[...] = jnp.full_like(m_row, -jnp.inf)
        s_row[...] = jnp.zeros_like(s_row)
        d_row[...] = jnp.zeros_like(d_row)

    scale = scale_ref[0, 0]                                   # f32 scalar (SMEM)
    img = img_ref[...]                                        # [block, D] native
    txt = txt_ref[...]                                        # [block, D] native

    # ---- logits tile on the MXU ('md,nd->mn', no transpose) -----------------
    # Scale applied to the f32 result: one VPU mul/element, keeps the MXU
    # operands in their native (bf16-friendly) dtype and the scale in f32.
    logits = lax.dot_general(
        img, txt, dimension_numbers=(((1,), (1,)), ((), ())),
        preferred_element_type=jnp.float32) * scale           # [block, block] f32

    # ---- diagonal (label logits), only on diagonal tiles --------------------
    @pl.when(j == gi)
    def _():
        prod = (img * txt).astype(jnp.float32)                # [block, D]
        d_row[...] = scale * jnp.sum(prod, axis=1, keepdims=True)   # [block, 1]

    # ---- single shared exp pass over the tile --------------------------------
    g = jnp.max(jnp.max(logits, axis=1, keepdims=True), axis=0, keepdims=True)
    e = jnp.exp(logits - g)                                   # [block, block] <= 1
    r_sum = jnp.sum(e, axis=1, keepdims=True)                 # [block, 1]
    c_sum = jnp.sum(e, axis=0, keepdims=True)                 # [1, block]

    # ---- row-direction (logits_per_image) online logsumexp -------------------
    m_r_new = jnp.maximum(m_row[...], g)
    s_row[...] = (s_row[...] * jnp.exp(m_row[...] - m_r_new)
                  + jnp.exp(g - m_r_new) * r_sum)
    m_row[...] = m_r_new

    # ---- column-direction (logits_per_text) online logsumexp -----------------
    m_c = m_col[j]                                            # [1, block]
    s_c = s_col[j]
    m_c_new = jnp.maximum(m_c, g)
    s_col[j] = s_c * jnp.exp(m_c - m_c_new) + jnp.exp(g - m_c_new) * c_sum
    m_col[j] = m_c_new

    # ---- per-row-tile finalize:  lse_row - 2 * scale * diag ------------------
    @pl.when(j == n_col_tiles - 1)
    def _():
        lse_r = m_row[...] + jnp.log(jnp.maximum(s_row[...], _TINY))
        row_ref[...] = (lse_r - 2.0 * d_row[...]).reshape(1, block, 1)

    # ---- per-split finalize of this column tile's partial LSE ----------------
    @pl.when(i == rows_per_split - 1)
    def _():
        lse_c = m_col[j] + jnp.log(jnp.maximum(s_col[j], _TINY))   # [1, block]
        lse_col_ref[...] = lse_c.reshape(1, 1, 1, block)


def _vmem_budget_bytes():
    """Generation-aware VMEM budget (physical capacity minus ~20% headroom)."""
    cap = 64 << 20                          # conservative fallback (v7x per-core)
    try:
        info = pltpu.get_tpu_info()
        cap = int(getattr(info, "vmem_capacity_bytes", cap) or cap)
    except Exception:
        pass
    # ~51 MiB on 64 MiB parts (v7x), ~102 MiB on 128 MiB parts (v5e/v6e).
    return max(int(cap * 0.8), 32 << 20)


def _pick_block(batch, dim, itemsize, budget):
    """Biggest MXU-friendly square logits tile that divides B and fits VMEM."""
    min_sub = {1: 32, 2: 16, 4: 8}.get(itemsize, 8)   # dtype min sublane tile

    def est(t):
        return (2 * 2 * t * dim * itemsize            # img + txt, double-buffered
                + 5 * t * t * 4                       # logits / E / temporaries
                + 8 * batch + 48 * t + (1 << 20))     # LSE scratch + margin

    for t in (2048, 1024, 512, 256, 128, 64, 32, 16, 8):
        if t >= min_sub and batch % t == 0 and est(t) <= budget:
            return t
    return batch   # full-extent fallback (exempt from the (8,128) rule)


def max_clip_loss(image_features, text_features, logit_scale, *,
                  block=None, n_splits=None):
    """Pallas implementation of Max_ClipLoss.forward (world_size=1)."""
    B, D = image_features.shape
    assert text_features.shape == (B, D), (image_features.shape,
                                           text_features.shape)
    if text_features.dtype != image_features.dtype:
        text_features = text_features.astype(image_features.dtype)
    itemsize = jnp.dtype(image_features.dtype).itemsize

    budget = _vmem_budget_bytes()
    if block is None:
        block = _pick_block(B, D, itemsize, budget)
    assert B % block == 0, (B, block)
    n_tiles = B // block

    # Split the row bands so megacore/v7x parts can shard them across cores;
    # harmless (same step count) on single-core chips.
    if n_splits is None:
        n_splits = 2 if (n_tiles >= 2 and n_tiles % 2 == 0) else 1
    assert n_tiles % n_splits == 0, (n_tiles, n_splits)
    rows_per_split = n_tiles // n_splits

    scale = jnp.asarray(logit_scale, jnp.float32).reshape(1, 1)

    kernel = functools.partial(_clip_loss_kernel,
                               rows_per_split=rows_per_split,
                               n_col_tiles=n_tiles)

    est = (2 * 2 * block * D * itemsize + 5 * block * block * 4
           + 8 * B + 48 * block + (1 << 20))
    vmem_limit = int(min(max(2 * est, 32 << 20), budget))

    cost = pl.CostEstimate(
        flops=2 * B * B * D + 8 * B * B,
        transcendentals=B * B + 6 * B,
        bytes_accessed=(n_tiles + 1) * B * D * itemsize + (n_splits + 2) * B * 4)

    grid_spec = pltpu.PrefetchScalarGridSpec(
        num_scalar_prefetch=0,
        grid=(n_splits, rows_per_split, n_tiles),
        in_specs=[
            pl.BlockSpec(memory_space=pltpu.MemorySpace.SMEM),          # scale
            pl.BlockSpec((block, D),
                         lambda c, i, j: (c * rows_per_split + i, 0)),   # image
            pl.BlockSpec((block, D), lambda c, i, j: (j, 0)),            # text
        ],
        out_specs=(
            # per-split, per-column-tile partial LSE (lane-dense last dim)
            pl.BlockSpec((1, 1, 1, block), lambda c, i, j: (c, j, 0, 0)),
            # per-row   lse_row - 2*scale*diag
            pl.BlockSpec((1, block, 1),
                         lambda c, i, j: (c * rows_per_split + i, 0, 0)),
        ),
        scratch_shapes=[
            pltpu.VMEM((block, 1), jnp.float32),             # m_row
            pltpu.VMEM((block, 1), jnp.float32),             # s_row
            pltpu.VMEM((block, 1), jnp.float32),             # d_row (scaled diag)
            pltpu.VMEM((n_tiles, 1, block), jnp.float32),    # m_col (per split)
            pltpu.VMEM((n_tiles, 1, block), jnp.float32),    # s_col (per split)
        ])

    lse_col_parts, row_terms = pl.pallas_call(
        kernel,
        out_shape=(
            jax.ShapeDtypeStruct((n_splits, n_tiles, 1, block), jnp.float32),
            jax.ShapeDtypeStruct((n_tiles, block, 1), jnp.float32),
        ),
        grid_spec=grid_spec,
        compiler_params=pltpu.CompilerParams(
            dimension_semantics=("parallel", "arbitrary", "arbitrary"),
            vmem_limit_bytes=vmem_limit),
        cost_estimate=cost,
    )(scale, image_features, text_features)

    # ---- tiny O(B) epilogue: merge per-split column-LSE partials, reduce ----
    lse_col_parts = lse_col_parts.reshape(n_splits, B)
    lse_col = lse_col_parts[0]
    for p in range(1, n_splits):
        lse_col = jnp.logaddexp(lse_col, lse_col_parts[p])
    total = jnp.sum(row_terms) + jnp.sum(lse_col)
    return 0.5 * total / B


def _reference_loss(image_features, text_features, logit_scale):
    logits_per_image = logit_scale * image_features @ text_features.T
    logits_per_text = logit_scale * text_features @ image_features.T
    labels = jnp.arange(image_features.shape[0])

    def ce(logits, labels):
        logits = logits.astype(jnp.float32)
        lse = jax.scipy.special.logsumexp(logits, axis=1)
        picked = jnp.take_along_axis(logits, labels[:, None], axis=1)[:, 0]
        return jnp.mean(lse - picked)

    return 0.5 * (ce(logits_per_image, labels) + ce(logits_per_text, labels))


if __name__ == "__main__":
    key = jax.random.PRNGKey(0)
    k1, k2, k3, k4, k5, k6 = jax.random.split(key, 6)

    def _make(k, b, d):
        x = jax.random.normal(k, (b, d), dtype=jnp.float32)
        return x / jnp.linalg.norm(x, axis=-1, keepdims=True)   # CLIP L2-norm

    logit_scale = jnp.float32(100.0)   # exp(learnable temperature), typical CLIP

    # Case 1: single tile, single split (block == B, grid (1,1,1)).
    B1, D1 = 8, 32
    img1, txt1 = _make(k1, B1, D1), _make(k2, B1, D1)
    loss1 = jax.block_until_ready(max_clip_loss(img1, txt1, logit_scale))
    ref1 = _reference_loss(img1, txt1, logit_scale)
    assert jnp.allclose(loss1, ref1, rtol=2e-4, atol=2e-4), (loss1, ref1)

    # Case 2: 2 splits x 1 row tile x 2 col tiles (online LSE + diag gating).
    B2, D2 = 16, 32
    img2, txt2 = _make(k3, B2, D2), _make(k4, B2, D2)
    loss2 = jax.block_until_ready(
        max_clip_loss(img2, txt2, logit_scale, block=8))
    ref2 = _reference_loss(img2, txt2, logit_scale)
    assert jnp.allclose(loss2, ref2, rtol=2e-4, atol=2e-4), (loss2, ref2)

    # Case 3: 2 splits x 2 row tiles x 4 col tiles (per-split column
    # accumulator reset, revisited column-LSE output blocks, off-diagonal
    # tiles, and the logaddexp combine epilogue).
    B3, D3 = 32, 32
    img3, txt3 = _make(k5, B3, D3), _make(k6, B3, D3)
    loss3 = jax.block_until_ready(
        max_clip_loss(img3, txt3, logit_scale, block=8))
    ref3 = _reference_loss(img3, txt3, logit_scale)
    assert jnp.allclose(loss3, ref3, rtol=2e-4, atol=2e-4), (loss3, ref3)

    print("KERNEL_OK")
</pallas_src>

<mosaic_0001>
module attributes {stable_mosaic.version = 11 : i64} {
  func.func @_clip_loss_kernel(%arg0: i32, %arg1: i32, %arg2: i32, %arg3: memref<1x1xf32, #tpu.memory_space<smem>>, %arg4: memref<8x32xf32, #tpu.memory_space<vmem>>, %arg5: memref<8x32xf32, #tpu.memory_space<vmem>>, %arg6: memref<1x1x1x8xf32, #tpu.memory_space<vmem>>, %arg7: memref<1x8x1xf32, #tpu.memory_space<vmem>>, %arg8: memref<8x1xf32, #tpu.memory_space<vmem>>, %arg9: memref<8x1xf32, #tpu.memory_space<vmem>>, %arg10: memref<8x1xf32, #tpu.memory_space<vmem>>, %arg11: memref<1x1x8xf32, #tpu.memory_space<vmem>>, %arg12: memref<1x1x8xf32, #tpu.memory_space<vmem>>) attributes {dimension_semantics = [#tpu.dimension_semantics<parallel>, #tpu.dimension_semantics<arbitrary>, #tpu.dimension_semantics<arbitrary>], iteration_bounds = array<i64: 1, 1, 1>, scalar_prefetch = 0 : i64, scratch_operands = 5 : i64, tpu.core_type = #tpu.core_type<tc>, window_params = [{transform_indices = @transform_0, window_bounds = array<i64: 1, 1>}, {transform_indices = @transform_1, window_bounds = array<i64: 8, 32>}, {transform_indices = @transform_2, window_bounds = array<i64: 8, 32>}, {transform_indices = @transform_3, window_bounds = array<i64: 1, 1, 1, 8>}, {transform_indices = @transform_4, window_bounds = array<i64: 1, 8, 1>}]} {
    %c1_i32 = arith.constant 1 : i32
    %0 = arith.muli %arg0, %c1_i32 : i32
    %1 = arith.addi %0, %arg1 : i32
    %c0_i32 = arith.constant 0 : i32
    %2 = arith.cmpi eq, %arg1, %c0_i32 : i32
    %c0_i32_0 = arith.constant 0 : i32
    %3 = arith.cmpi eq, %arg2, %c0_i32_0 : i32
    %4 = arith.andi %2, %3 : i1
    %5 = arith.extui %4 : i1 to i32
    %c0_i32_1 = arith.constant 0 : i32
    %6 = arith.cmpi ne, %5, %c0_i32_1 : i32
    scf.if %6 {
      %cst_36 = arith.constant 0xFF800000 : f32
      %75 = vector.broadcast %cst_36 : f32 to vector<1x1x8xf32>
      %c0_37 = arith.constant 0 : index
      %c0_38 = arith.constant 0 : index
      %c0_39 = arith.constant 0 : index
      %76 = vector.load %arg11[%c0_37, %c0_38, %c0_39] : memref<1x1x8xf32, #tpu.memory_space<vmem>>, vector<1x1x8xf32>
      tpu.vector_store %arg11[%c0_37, %c0_38, %c0_39], %75 {strides = array<i32>} : memref<1x1x8xf32, #tpu.memory_space<vmem>>, vector<1x1x8xf32>,
      %cst_40 = arith.constant 0.000000e+00 : f32
      %77 = vector.broadcast %cst_40 : f32 to vector<1x1x8xf32>
      %c0_41 = arith.constant 0 : index
      %c0_42 = arith.constant 0 : index
      %c0_43 = arith.constant 0 : index
      %78 = vector.load %arg12[%c0_41, %c0_42, %c0_43] : memref<1x1x8xf32, #tpu.memory_space<vmem>>, vector<1x1x8xf32>
      tpu.vector_store %arg12[%c0_41, %c0_42, %c0_43], %77 {strides = array<i32>} : memref<1x1x8xf32, #tpu.memory_space<vmem>>, vector<1x1x8xf32>,
    } else {
    }
    %c0_i32_2 = arith.constant 0 : i32
    %7 = arith.cmpi eq, %arg2, %c0_i32_2 : i32
    %8 = arith.extui %7 : i1 to i32
    %c0_i32_3 = arith.constant 0 : i32
    %9 = arith.cmpi ne, %8, %c0_i32_3 : i32
    scf.if %9 {
      %cst_36 = arith.constant 0xFF800000 : f32
      %75 = vector.broadcast %cst_36 : f32 to vector<8x1xf32>
      %c0_37 = arith.constant 0 : index
      %c0_38 = arith.constant 0 : index
      %76 = vector.load %arg8[%c0_37, %c0_38] : memref<8x1xf32, #tpu.memory_space<vmem>>, vector<8x1xf32>
      tpu.vector_store %arg8[%c0_37, %c0_38], %75 {strides = array<i32>} : memref<8x1xf32, #tpu.memory_space<vmem>>, vector<8x1xf32>,
      %cst_39 = arith.constant 0.000000e+00 : f32
      %77 = vector.broadcast %cst_39 : f32 to vector<8x1xf32>
      %c0_40 = arith.constant 0 : index
      %c0_41 = arith.constant 0 : index
      %78 = vector.load %arg9[%c0_40, %c0_41] : memref<8x1xf32, #tpu.memory_space<vmem>>, vector<8x1xf32>
      tpu.vector_store %arg9[%c0_40, %c0_41], %77 {strides = array<i32>} : memref<8x1xf32, #tpu.memory_space<vmem>>, vector<8x1xf32>,
      %cst_42 = arith.constant 0.000000e+00 : f32
      %79 = vector.broadcast %cst_42 : f32 to vector<8x1xf32>
      %c0_43 = arith.constant 0 : index
      %c0_44 = arith.constant 0 : index
      %80 = vector.load %arg10[%c0_43, %c0_44] : memref<8x1xf32, #tpu.memory_space<vmem>>, vector<8x1xf32>
      tpu.vector_store %arg10[%c0_43, %c0_44], %79 {strides = array<i32>} : memref<8x1xf32, #tpu.memory_space<vmem>>, vector<8x1xf32>,
    } else {
    }
    %c0 = arith.constant 0 : index
    %c0_4 = arith.constant 0 : index
    %10 = memref.load %arg3[%c0, %c0_4] : memref<1x1xf32, #tpu.memory_space<smem>>
    %c0_5 = arith.constant 0 : index
    %c0_6 = arith.constant 0 : index
    %11 = vector.load %arg4[%c0_5, %c0_6] : memref<8x32xf32, #tpu.memory_space<vmem>>, vector<8x32xf32>
    %c0_7 = arith.constant 0 : index
    %c0_8 = arith.constant 0 : index
    %12 = vector.load %arg5[%c0_7, %c0_8] : memref<8x32xf32, #tpu.memory_space<vmem>>, vector<8x32xf32>
    %cst = arith.constant dense<0.000000e+00> : vector<8x8xf32>
    %13 = tpu.matmul %11, %12, %cst {dimension_numbers = #tpu.dot_dimension_numbers<[1], [1], [0], [0], [0, 0, 1, 0], [], []>} : vector<8x32xf32>, vector<8x32xf32>, vector<8x8xf32> -> vector<8x8xf32>
    %14 = vector.broadcast %10 : f32 to vector<8x8xf32>
    %15 = arith.mulf %13, %14 : vector<8x8xf32>
    %16 = arith.cmpi eq, %arg2, %1 : i32
    %17 = arith.extui %16 : i1 to i32
    %c0_i32_9 = arith.constant 0 : i32
    %18 = arith.cmpi ne, %17, %c0_i32_9 : i32
    scf.if %18 {
      %75 = arith.mulf %11, %12 : vector<8x32xf32>
      %cst_36 = arith.constant dense<0.000000e+00> : vector<8xf32>
      %76 = vector.multi_reduction <add>, %75, %cst_36 [1] : vector<8x32xf32> to vector<8xf32>
      %77 = vector.shape_cast %76 : vector<8xf32> to vector<8x1xf32>
      %78 = vector.broadcast %10 : f32 to vector<8x1xf32>
      %79 = arith.mulf %78, %77 : vector<8x1xf32>
      %c0_37 = arith.constant 0 : index
      %c0_38 = arith.constant 0 : index
      %80 = vector.load %arg10[%c0_37, %c0_38] : memref<8x1xf32, #tpu.memory_space<vmem>>, vector<8x1xf32>
      tpu.vector_store %arg10[%c0_37, %c0_38], %79 {strides = array<i32>} : memref<8x1xf32, #tpu.memory_space<vmem>>, vector<8x1xf32>,
    } else {
    }
    %cst_10 = arith.constant dense<0xFF800000> : vector<8xf32>
    %19 = vector.multi_reduction <maximumf>, %15, %cst_10 [1] : vector<8x8xf32> to vector<8xf32>
    %20 = vector.shape_cast %19 : vector<8xf32> to vector<8x1xf32>
    %cst_11 = arith.constant dense<0xFF800000> : vector<1xf32>
    %21 = vector.multi_reduction <maximumf>, %20, %cst_11 [0] : vector<8x1xf32> to vector<1xf32>
    %22 = vector.shape_cast %21 : vector<1xf32> to vector<1x1xf32>
    %23 = vector.broadcast %22 : vector<1x1xf32> to vector<8x8xf32>
    %24 = arith.subf %15, %23 : vector<8x8xf32>
    %25 = math.exp %24 : vector<8x8xf32>
    %cst_12 = arith.constant dense<0.000000e+00> : vector<8xf32>
    %26 = vector.multi_reduction <add>, %25, %cst_12 [1] : vector<8x8xf32> to vector<8xf32>
    %27 = vector.shape_cast %26 : vector<8xf32> to vector<8x1xf32>
    %cst_13 = arith.constant dense<0.000000e+00> : vector<8xf32>
    %28 = vector.multi_reduction <add>, %25, %cst_13 [0] : vector<8x8xf32> to vector<8xf32>
    %29 = vector.shape_cast %28 : vector<8xf32> to vector<1x8xf32>
    %c0_14 = arith.constant 0 : index
    %c0_15 = arith.constant 0 : index
    %30 = vector.load %arg8[%c0_14, %c0_15] : memref<8x1xf32, #tpu.memory_space<vmem>>, vector<8x1xf32>
    %31 = vector.broadcast %22 : vector<1x1xf32> to vector<8x1xf32>
    %32 = arith.maximumf %30, %31 : vector<8x1xf32>
    %c0_16 = arith.constant 0 : index
    %c0_17 = arith.constant 0 : index
    %33 = vector.load %arg9[%c0_16, %c0_17] : memref<8x1xf32, #tpu.memory_space<vmem>>, vector<8x1xf32>
    %c0_18 = arith.constant 0 : index
    %c0_19 = arith.constant 0 : index
    %34 = vector.load %arg8[%c0_18, %c0_19] : memref<8x1xf32, #tpu.memory_space<vmem>>, vector<8x1xf32>
    %35 = arith.subf %34, %32 : vector<8x1xf32>
    %36 = math.exp %35 : vector<8x1xf32>
    %37 = arith.mulf %33, %36 : vector<8x1xf32>
    %38 = vector.broadcast %22 : vector<1x1xf32> to vector<8x1xf32>
    %39 = arith.subf %38, %32 : vector<8x1xf32>
    %40 = math.exp %39 : vector<8x1xf32>
    %41 = arith.mulf %40, %27 : vector<8x1xf32>
    %42 = arith.addf %37, %41 : vector<8x1xf32>
    %c0_20 = arith.constant 0 : index
    %c0_21 = arith.constant 0 : index
    %43 = vector.load %arg9[%c0_20, %c0_21] : memref<8x1xf32, #tpu.memory_space<vmem>>, vector<8x1xf32>
    tpu.vector_store %arg9[%c0_20, %c0_21], %42 {strides = array<i32>} : memref<8x1xf32, #tpu.memory_space<vmem>>, vector<8x1xf32>,
    %c0_22 = arith.constant 0 : index
    %c0_23 = arith.constant 0 : index
    %44 = vector.load %arg8[%c0_22, %c0_23] : memref<8x1xf32, #tpu.memory_space<vmem>>, vector<8x1xf32>
    tpu.vector_store %arg8[%c0_22, %c0_23], %32 {strides = array<i32>} : memref<8x1xf32, #tpu.memory_space<vmem>>, vector<8x1xf32>,
    %45 = arith.index_cast %arg2 : i32 to index
    %c0_24 = arith.constant 0 : index
    %c0_25 = arith.constant 0 : index
    %46 = vector.load %arg11[%45, %c0_24, %c0_25] : memref<1x1x8xf32, #tpu.memory_space<vmem>>, vector<1x1x8xf32>
    %47 = vector.shape_cast %46 : vector<1x1x8xf32> to vector<1x8xf32>
    %48 = arith.index_cast %arg2 : i32 to index
    %c0_26 = arith.constant 0 : index
    %c0_27 = arith.constant 0 : index
    %49 = vector.load %arg12[%48, %c0_26, %c0_27] : memref<1x1x8xf32, #tpu.memory_space<vmem>>, vector<1x1x8xf32>
    %50 = vector.shape_cast %49 : vector<1x1x8xf32> to vector<1x8xf32>
    %51 = vector.broadcast %22 : vector<1x1xf32> to vector<1x8xf32>
    %52 = arith.maximumf %47, %51 : vector<1x8xf32>
    %53 = arith.subf %47, %52 : vector<1x8xf32>
    %54 = math.exp %53 : vector<1x8xf32>
    %55 = arith.mulf %50, %54 : vector<1x8xf32>
    %56 = vector.broadcast %22 : vector<1x1xf32> to vector<1x8xf32>
    %57 = arith.subf %56, %52 : vector<1x8xf32>
    %58 = math.exp %57 : vector<1x8xf32>
    %59 = arith.mulf %58, %29 : vector<1x8xf32>
    %60 = arith.addf %55, %59 : vector<1x8xf32>
    %61 = arith.index_cast %arg2 : i32 to index
    %c0_28 = arith.constant 0 : index
    %c0_29 = arith.constant 0 : index
    %62 = vector.load %arg12[%61, %c0_28, %c0_29] : memref<1x1x8xf32, #tpu.memory_space<vmem>>, vector<1x1x8xf32>
    %63 = vector.shape_cast %62 : vector<1x1x8xf32> to vector<1x8xf32>
    %64 = vector.shape_cast %60 : vector<1x8xf32> to vector<1x1x8xf32>
    tpu.vector_store %arg12[%61, %c0_28, %c0_29], %64 {strides = array<i32>} : memref<1x1x8xf32, #tpu.memory_space<vmem>>, vector<1x1x8xf32>,
    %65 = arith.index_cast %arg2 : i32 to index
    %c0_30 = arith.constant 0 : index
    %c0_31 = arith.constant 0 : index
    %66 = vector.load %arg11[%65, %c0_30, %c0_31] : memref<1x1x8xf32, #tpu.memory_space<vmem>>, vector<1x1x8xf32>
    %67 = vector.shape_cast %66 : vector<1x1x8xf32> to vector<1x8xf32>
    %68 = vector.shape_cast %52 : vector<1x8xf32> to vector<1x1x8xf32>
    tpu.vector_store %arg11[%65, %c0_30, %c0_31], %68 {strides = array<i32>} : memref<1x1x8xf32, #tpu.memory_space<vmem>>, vector<1x1x8xf32>,
    %c0_i32_32 = arith.constant 0 : i32
    %69 = arith.cmpi eq, %arg2, %c0_i32_32 : i32
    %70 = arith.extui %69 : i1 to i32
    %c0_i32_33 = arith.constant 0 : i32
    %71 = arith.cmpi ne, %70, %c0_i32_33 : i32
    scf.if %71 {
      %c0_36 = arith.constant 0 : index
      %c0_37 = arith.constant 0 : index
      %75 = vector.load %arg8[%c0_36, %c0_37] : memref<8x1xf32, #tpu.memory_space<vmem>>, vector<8x1xf32>
      %c0_38 = arith.constant 0 : index
      %c0_39 = arith.constant 0 : index
      %76 = vector.load %arg9[%c0_38, %c0_39] : memref<8x1xf32, #tpu.memory_space<vmem>>, vector<8x1xf32>
      %cst_40 = arith.constant 9.99999991E-38 : f32
      %77 = vector.broadcast %cst_40 : f32 to vector<8x1xf32>
      %78 = arith.maximumf %76, %77 : vector<8x1xf32>
      %79 = math.log %78 : vector<8x1xf32>
      %80 = arith.addf %75, %79 : vector<8x1xf32>
      %c0_41 = arith.constant 0 : index
      %c0_42 = arith.constant 0 : index
      %81 = vector.load %arg10[%c0_41, %c0_42] : memref<8x1xf32, #tpu.memory_space<vmem>>, vector<8x1xf32>
      %cst_43 = arith.constant 2.000000e+00 : f32
      %82 = vector.broadcast %cst_43 : f32 to vector<8x1xf32>
      %83 = arith.mulf %82, %81 : vector<8x1xf32>
      %84 = arith.subf %80, %83 : vector<8x1xf32>
      %85 = vector.shape_cast %84 : vector<8x1xf32> to vector<1x8x1xf32>
      %c0_44 = arith.constant 0 : index
      %c0_45 = arith.constant 0 : index
      %c0_46 = arith.constant 0 : index
      %86 = vector.load %arg7[%c0_44, %c0_45, %c0_46] : memref<1x8x1xf32, #tpu.memory_space<vmem>>, vector<1x8x1xf32>
      tpu.vector_store %arg7[%c0_44, %c0_45, %c0_46], %85 {strides = array<i32>} : memref<1x8x1xf32, #tpu.memory_space<vmem>>, vector<1x8x1xf32>,
    } else {
    }
    %c0_i32_34 = arith.constant 0 : i32
    %72 = arith.cmpi eq, %arg1, %c0_i32_34 : i32
    %73 = arith.extui %72 : i1 to i32
    %c0_i32_35 = arith.constant 0 : i32
    %74 = arith.cmpi ne, %73, %c0_i32_35 : i32
    scf.if %74 {
      %75 = arith.index_cast %arg2 : i32 to index
      %c0_36 = arith.constant 0 : index
      %c0_37 = arith.constant 0 : index
      %76 = vector.load %arg11[%75, %c0_36, %c0_37] : memref<1x1x8xf32, #tpu.memory_space<vmem>>, vector<1x1x8xf32>
      %77 = vector.shape_cast %76 : vector<1x1x8xf32> to vector<1x8xf32>
      %78 = arith.index_cast %arg2 : i32 to index
      %c0_38 = arith.constant 0 : index
      %c0_39 = arith.constant 0 : index
      %79 = vector.load %arg12[%78, %c0_38, %c0_39] : memref<1x1x8xf32, #tpu.memory_space<vmem>>, vector<1x1x8xf32>
      %80 = vector.shape_cast %79 : vector<1x1x8xf32> to vector<1x8xf32>
      %cst_40 = arith.constant 9.99999991E-38 : f32
      %81 = vector.broadcast %cst_40 : f32 to vector<1x8xf32>
      %82 = arith.maximumf %80, %81 : vector<1x8xf32>
      %83 = math.log %82 : vector<1x8xf32>
      %84 = arith.addf %77, %83 : vector<1x8xf32>
      %85 = vector.shape_cast %84 : vector<1x8xf32> to vector<1x1x1x8xf32>
      %c0_41 = arith.constant 0 : index
      %c0_42 = arith.constant 0 : index
      %c0_43 = arith.constant 0 : index
      %c0_44 = arith.constant 0 : index
      %86 = vector.load %arg6[%c0_41, %c0_42, %c0_43, %c0_44] : memref<1x1x1x8xf32, #tpu.memory_space<vmem>>, vector<1x1x1x8xf32>
      tpu.vector_store %arg6[%c0_41, %c0_42, %c0_43, %c0_44], %85 {strides = array<i32>} : memref<1x1x1x8xf32, #tpu.memory_space<vmem>>, vector<1x1x1x8xf32>,
    } else {
    }
    return
  }
  func.func @transform_0(%arg0: i32, %arg1: i32, %arg2: i32) -> (i32, i32) {
    %c0_i32 = arith.constant 0 : i32
    %c0_i32_0 = arith.constant 0 : i32
    %c0_i32_1 = arith.constant 0 : i32
    return %c0_i32, %c0_i32_0 : i32, i32
  }
  func.func @transform_1(%arg0: i32, %arg1: i32, %arg2: i32) -> (i32, i32) {
    %c1_i32 = arith.constant 1 : i32
    %0 = arith.muli %arg0, %c1_i32 : i32
    %1 = arith.addi %0, %arg1 : i32
    %c0_i32 = arith.constant 0 : i32
    %c0_i32_0 = arith.constant 0 : i32
    return %1, %c0_i32 : i32, i32
  }
  func.func @transform_2(%arg0: i32, %arg1: i32, %arg2: i32) -> (i32, i32) {
    %c0_i32 = arith.constant 0 : i32
    %c0_i32_0 = arith.constant 0 : i32
    return %arg2, %c0_i32 : i32, i32
  }
  func.func @transform_3(%arg0: i32, %arg1: i32, %arg2: i32) -> (i32, i32, i32, i32) {
    %c0_i32 = arith.constant 0 : i32
    %c0_i32_0 = arith.constant 0 : i32
    %c0_i32_1 = arith.constant 0 : i32
    return %arg0, %arg2, %c0_i32, %c0_i32_0 : i32, i32, i32, i32
  }
  func.func @transform_4(%arg0: i32, %arg1: i32, %arg2: i32) -> (i32, i32, i32) {
    %c1_i32 = arith.constant 1 : i32
    %0 = arith.muli %arg0, %c1_i32 : i32
    %1 = arith.addi %0, %arg1 : i32
    %c0_i32 = arith.constant 0 : i32
    %c0_i32_0 = arith.constant 0 : i32
    %c0_i32_1 = arith.constant 0 : i32
    return %1, %c0_i32, %c0_i32_0 : i32, i32, i32
  }
}

</mosaic_0001>

<bundles_post_ra>
// kernel: tpu_custom_call.1
= control target key start
LH: loop header
LB: loop body
LE: loop exit
PB: predicated region body
PF: predicated region fallthrough
CT: control target
= control target key end

     0   :  { %11 = vsyncpa [#allocation9], 0  ;;  %s472_s0 = inlined_call_operand.<no memory space> [shape: f32[1,1], index: 0, kind: input, shape index: {}]   ;;  %s473_s1 = inlined_call_operand.hbm [shape: f32[8,32], index: 1, kind: input, shape index: {}]   ;;  %s474_s2 = inlined_call_operand.hbm [shape: f32[8,32], index: 2, kind: input, shape index: {}]   ;;  %s475_s3 = inlined_call_operand.hbm [shape: f32[1,1,1,8], index: 3, kind: output, shape index: {0}]   ;;  %s476_s4 = inlined_call_operand.vmem [shape: f32[1,8,1], index: 4, kind: output, shape index: {1}]  }
   0x1   :  { %12 = vsyncpa [#allocation12], 0 }
   0x2   :  { %13 = vsyncpa [#allocation10], 0  ;;  %s382_s15 = smov [#allocation8]   ;;  %s383_s17 = smov [#allocation11]  }
   0x3   :  { %s25_s16 = sshll.u32 %s382_s15, 4  ;;  %s35_s18 = sshll.u32 %s383_s17, 4  ;;  %s26_s16 = int_to_ptr.vmem [resolvable:$true] %s25_s16  ;;  %s36_s18 = int_to_ptr.vmem [resolvable:$true] %s35_s18 }
   0x4   :  { %s310_s21 = scalar_lea.hbm %s473_s1, 128 }
   0x5   :  { %p311_p0 = scmp.ne.s32.totalorder %s473_s1, %s310_s21  ;;  %p314_p1 = scmp.lt.u32.totalorder %s310_s21, %s473_s1 }
   0x7   :  { %p316_p2 = pnand %p314_p1, %p311_p0 }
   0x9   :  { %319 = shalt.err (!%p316_p2)
}
   0xa   :  { %s320_s26 = scalar_lea.vmem %s26_s16, 128  ;;  %p325_p4 = scmp.lt.s32.totalorder %s26_s16, %s26_s16 }
   0xb   :  { %p321_p3 = scmp.ne.s32.totalorder %s26_s16, %s320_s26  ;;  %p326_p5 = scmp.lt.s32.totalorder %s320_s26, %s320_s26 }
   0xd   :  { %p327_p6 = por %p326_p5, %p325_p4 }
   0xf   :  { %p328_p7 = pnand %p327_p6, %p321_p3 }
  0x11   :  { %331 = shalt.err (!%p328_p7)
}
  0x12   :  { %28 = dma.hbm_to_vmem [thread:$0]  %s473_s1, 128, %s26_s16, [#allocation9]  }
  0x13   :  { %s332_s5 = scalar_lea.hbm %s474_s2, 128 }
  0x14   :  { %p333_p8 = scmp.ne.s32.totalorder %s474_s2, %s332_s5  ;;  %p336_p9 = scmp.lt.u32.totalorder %s332_s5, %s474_s2 }
  0x16   :  { %p338_p10 = pnand %p336_p9, %p333_p8 }
  0x18   :  { %341 = shalt.err (!%p338_p10)
}
  0x19   :  { %s342_s10 = scalar_lea.vmem %s36_s18, 128  ;;  %p347_p12 = scmp.lt.s32.totalorder %s36_s18, %s36_s18 }
  0x1a   :  { %p343_p11 = scmp.ne.s32.totalorder %s36_s18, %s342_s10  ;;  %p348_p13 = scmp.lt.s32.totalorder %s342_s10, %s342_s10 }
  0x1c   :  { %p349_p0 = por %p348_p13, %p347_p12 }
  0x1e   :  { %p350_p1 = pnand %p349_p0, %p343_p11 }
  0x20   :  { %353 = shalt.err (!%p350_p1)
}
  0x21   :  { %38 = dma.hbm_to_vmem [thread:$0]  %s474_s2, 128, %s36_s18, [#allocation12]  }
  0x22   :  { %376 = dma.done.wait [#allocation9], 128  }
  0x23   :  { %377 = vsyncadd [#allocation9], 4294967168 }
  0x24   :  { %378 = dma.done.wait [#allocation12], 128  }
  0x25   :  { %379 = vsyncadd [#allocation12], 4294967168  ;;  %vm70_vm0 = vcmask 7168   ;;  %v384_v0 = vmov 0.0   ;;  %vm385_vm1 = vmmov 0   ;;  %vm77_vm2 = vcmask 261120  }
  0x26   :  { %72 = vst.msk [vmem:[#allocation3] sm:$0xff] %vm70_vm0, %v384_v0  ;;  %73 = vst.msk [vmem:[#allocation4] sm:$0xff] %vm70_vm0, %v384_v0  ;;  %285 = vmatprep.subr.mxu0 %v384_v0  ;;  %287 = vmatprep.mubr.msk.f32.mxu0 %vm385_vm1, %v384_v0  ;;  %v76_v1 = vld [vmem:[#allocation11] sm:$0xff]  ;;  %v75_v2 = vld [vmem:[#allocation8] sm:$0xff]  ;;  %v154_v3 = vstv %s472_s0  ;;  %vm167_vm3 = vcmask 64512   ;;  %v386_v8 = vmov -inf  }
  0x27   :  { %286 = vmatpush3.xpose.msk.msra.mxu0 %vm77_vm2, %v76_v1  ;;  %71 = vst.msk [vmem:[#allocation2] sm:$0xff] %vm70_vm0, %v386_v8  ;;  %vm64_vm4 = vcmask 57344   ;;  %v160_v9 = vmul.f32 %v76_v1, %v75_v2  ;;  %s387_s0 = smov [#allocation13]  }
  0x28   :  { %65 = vst.msk [vmem:[#allocation5] sm:$0x1] %vm64_vm4, %v386_v8  ;;  %66 = vst.msk [vmem:[#allocation6] sm:$0x1] %vm64_vm4, %v384_v0  ;;  %s253_s13 = sshll.u32 %s387_s0, 4  ;;  %s254_s13 = int_to_ptr.vmem [resolvable:$true] %s253_s13 }
  0x29   :  { %v161_v10 = vsel %vm77_vm2, %v160_v9, 0.0  ;;  %s354_s14 = scalar_lea.vmem %s254_s13, 16  ;;  %s358_s15 = scalar_lea.vmem %s254_s13, 32 }
  0x2a   :  { %288 = vmatmul.mubr.msk.f32.vlgmr.msra.gmra.mrb[0].mxu0 %vm77_vm2, %v75_v2  ;;  %162 = vadd.xlane.f32.xlu1 %v161_v10  ;;  %p355_p2 = scmp.ne.s32.totalorder %s254_s13, %s354_s14  ;;  %p359_p3 = scmp.lt.s32.totalorder %s254_s13, %s254_s13 }
  0x2b   :  { %p360_p4 = scmp.lt.s32.totalorder %s358_s15, %s354_s14 }
  0x2d   :  { %p361_p5 = por %p360_p4, %p359_p3 }
  0x2e   :  { %v189_v17 = vld [vmem:[#allocation2] sm:$0xff] }
  0x2f   :  { %v204_v18 = vld [vmem:[#allocation5] sm:$0x1]  ;;  %v205_v38 = vld [vmem:[#allocation6] sm:$0x1]  ;;  %p362_p6 = pnand %p361_p5, %p355_p2 }
  0xb7   :  { %v163_v46 = vpop.xlane.xlu1 %162 }
  0xb8   :  { %v164_v47 = vmul.f32 %v163_v46, %v154_v3 }
  0xba   :  { %166 = vst.msk [vmem:[#allocation4] sm:$0xff] %vm70_vm0, %v164_v47 }
  0xfd   :  { %v150_v4 = vpop.f32.mrb[0].mxu0 }
  0xfe   :  { %v155_v5 = vmul.f32 %v154_v3, %v150_v4  ;;  %v289_v6 = vpop.f32.mrb[1].mxu0 }
 0x100   :  { %v168_v7 = vsel %vm167_vm3, %v155_v5, -inf }
 0x101   :  { %169 = vmax.xlane.f32.xlu0 %v168_v7 }
 0x18e   :  { %v170_v11 = vpop.xlane.xlu0 %169 }
 0x18f   :  { %v171_v12 = vrot.slane %v170_v11, 4 }
 0x191   :  { %v172_v13 = vmax.f32 %v170_v11, %v171_v12 }
 0x193   :  { %v173_v14 = vrot.slane %v172_v13, 2 }
 0x195   :  { %v174_v15 = vmax.f32 %v172_v13, %v173_v14 }
 0x197   :  { %v175_v16 = vrot.slane %v174_v15, 1 }
 0x199   :  { %v176_v19 = vmax.f32 %v174_v15, %v175_v16 }
 0x19b   :  { %v177_v20 = vsub.f32 %v155_v5, %v176_v19  ;;  %v190_v21 = vmax.f32 %v189_v17, %v176_v19  ;;  %v206_v22 = vmax.f32 %v204_v18, %v176_v19 }
 0x19d   :  { %v178_v23 = vmul.f32 1.442695, %v177_v20  ;;  %v192_v24 = vsub.f32 %v189_v17, %v190_v21  ;;  %v196_v25 = vsub.f32 %v176_v19, %v190_v21  ;;  %203 = vst.msk [vmem:[#allocation2] sm:$0xff] %vm70_vm0, %v190_v21  ;;  %v207_v26 = vsub.f32 %v204_v18, %v206_v22 }
 0x19e   :  { %218 = vst.msk [vmem:[#allocation5] sm:$0x1] %vm64_vm4, %v206_v22  ;;  %v211_v27 = vsub.f32 %v176_v19, %v206_v22 }
 0x19f   :  { %296 = vpow2.f32 %v178_v23  ;;  %v208_v28 = vmul.f32 1.442695, %v207_v26 }
 0x1a0   :  { %v212_v29 = vmul.f32 1.442695, %v211_v27 }
 0x1a1   :  { %298 = vpow2.f32 %v208_v28 }
 0x1a2   :  { %300 = vpow2.f32 %v212_v29 }
 0x1a5   :  { %v235_v50 = vld [vmem:[#allocation5] sm:$0x1] }
 0x1a9   :  { %v297_v30 = vpop.eup %296 }
 0x1aa   :  { %v180_v31 = vsel %vm167_vm3, %v297_v30, 0.0 }
 0x1ab   :  { %181 = vadd.xlane.f32.xlu0 %v180_v31  ;;  %v183_v32 = vrot.slane %v180_v31, 4  ;;  %v299_v37 = vpop.eup %298 }
 0x1ac   :  { %v301_v40 = vpop.eup %300  ;;  %v210_v41 = vmul.f32 %v299_v37, %v205_v38 }
 0x1ad   :  { %v184_v33 = vadd.f32 %v183_v32, %v180_v31 }
 0x1af   :  { %v185_v34 = vrot.slane %v184_v33, 2 }
 0x1b1   :  { %v186_v35 = vadd.f32 %v185_v34, %v184_v33 }
 0x1b3   :  { %v187_v36 = vrot.slane %v186_v35, 1 }
 0x1b5   :  { %v188_v39 = vadd.f32 %v187_v36, %v186_v35 }
 0x1b7   :  { %v214_v42 = vmul.f32 %v301_v40, %v188_v39 }
 0x1b9   :  { %v215_v43 = vadd.f32 %v214_v42, %v210_v41 }
 0x1bb   :  { %217 = vst.msk [vmem:[#allocation6] sm:$0x1] %vm64_vm4, %v215_v43 }
 0x1c2   :  { %v236_v44 = vld [vmem:[#allocation6] sm:$0x1] }
 0x1c3   :  { %v237_v45 = vmax.f32 %v236_v44, 1e-37 }
 0x1c5   :  { %302 = vlog2.f32 %v237_v45 }
 0x1cf   :  { %v303_v48 = vpop.eup %302 }
 0x1d0   :  { %v239_v49 = vmul.f32 0.6931472, %v303_v48 }
 0x1d2   :  { %v240_v51 = vadd.f32 %v239_v49, %v235_v50 }
 0x1d4   :  { %241 = vst.msk [vmem:[#allocation13] sm:$0x1] %vm64_vm4, %v240_v51 }
 0x1d5   :  { %365 = shalt.err (!%p362_p6)
}
 0x1d6   :  { %s366_s18 = scalar_lea.hbm %s475_s3, 16 }
 0x1d7   :  { %p367_p7 = scmp.ne.s32.totalorder %s475_s3, %s366_s18  ;;  %p370_p8 = scmp.lt.u32.totalorder %s366_s18, %s475_s3 }
 0x1d9   :  { %p372_p9 = pnand %p370_p8, %p367_p7 }
 0x1db   :  { %375 = shalt.err (!%p372_p9)
}
 0x1dc   :  { %256 = dma.vmem_to_hbm [thread:$0]  %s254_s13, 16, %s475_s3, [#allocation10]   ;;  %v193_v52 = vmul.f32 1.442695, %v192_v24  ;;  %v197_v53 = vmul.f32 1.442695, %v196_v25 }
 0x1dd   :  { %v191_v55 = vld [vmem:[#allocation3] sm:$0xff]  ;;  %v228_v63 = vld [vmem:[#allocation4] sm:$0xff]  ;;  %v222_v3 = vld [vmem:[#allocation2] sm:$0xff] }
 0x1de   :  { %304 = vpow2.f32 %v193_v52  ;;  %v229_v2 = vmul.f32 2.0, %v228_v63 }
 0x1df   :  { %306 = vpow2.f32 %v197_v53 }
 0x1e8   :  { %v305_v54 = vpop.eup %304 }
 0x1e9   :  { %v307_v56 = vpop.eup %306  ;;  %v195_v58 = vmul.f32 %v305_v54, %v191_v55 }
 0x238   :  { %v182_v57 = vpop.xlane.xlu0 %181 }
 0x239   :  { %v199_v59 = vmul.f32 %v307_v56, %v182_v57 }
 0x23b   :  { %v200_v60 = vadd.f32 %v199_v59, %v195_v58 }
 0x23d   :  { %202 = vst.msk [vmem:[#allocation3] sm:$0xff] %vm70_vm0, %v200_v60 }
 0x244   :  { %v223_v61 = vld [vmem:[#allocation3] sm:$0xff] }
 0x245   :  { %v224_v62 = vmax.f32 %v223_v61, 1e-37 }
 0x247   :  { %308 = vlog2.f32 %v224_v62 }
 0x251   :  { %v309_v0 = vpop.eup %308 }
 0x252   :  { %v226_v1 = vmul.f32 0.6931472, %v309_v0 }
 0x254   :  { %v227_v4 = vadd.f32 %v226_v1, %v222_v3 }
 0x256   :  { %v230_v5 = vsub.f32 %v227_v4, %v229_v2 }
 0x258   :  { %231 = vst.msk [vmem:[%s476_s4] sm:$0xff] %vm70_vm0, %v230_v5 }
 0x259   :  { %380 = dma.done.wait [#allocation10], 16  }
 0x25a   :  { %381 = vsyncadd [#allocation10], 4294967280 }
 0x25b   :  { %270 = vsyncpa [#allocation9], 1 }
 0x25c   :  { %271 = vsyncpa [#allocation12], 1 }
 0x25d   :  { %272 = vsyncpa [#allocation10], 1 }

</bundles_post_ra>
